<compile_context>
chip_gen: v6e
topology: v6e:2x2x1
jax: 0.10.0
libtpu: 0.0.40
codegen_flags: <defaults>
</compile_context>

<pallas_src>
import functools

import jax
import jax.numpy as jnp
from jax import lax
from jax.experimental import pallas as pl
from jax.experimental.pallas import tpu as pltpu

LANE = 128            # last dim -> vreg lanes
SUBLANE = 8
MAX_TILE_ROWS = 4096  # (4096, 128) f32 block = 2 MiB -> ~roofline HBM transfers


def _bce_blur_kernel(pred_ref, true_ref, out_ref, acc_ref, *,
                     inv_alpha, valid_rows, k_tiles):
    c = pl.program_id(0)            # TensorCore split (CORE_PARALLEL on v7x)
    k = pl.program_id(1)            # row-tile index within split ("arbitrary")
    n_k = pl.num_programs(1)

    @pl.when(k == 0)
    def _init():
        acc_ref[...] = jnp.zeros_like(acc_ref)

    x = pred_ref[...].astype(jnp.float32)
    t = true_ref[...].astype(jnp.float32)

    # Numerically stable BCE-with-logits, sharing z = exp(-|x|) with sigmoid:
    #   bce     = max(x, 0) - x*t + log1p(z)
    #   sigmoid = 1/(1+z)  (x >= 0)   |   z/(1+z)  (x < 0)
    z = jnp.exp(-jnp.abs(x))
    bce = jnp.maximum(x, 0.0) - x * t + jnp.log1p(z)

    r = pl.reciprocal(1.0 + z, approx=True)     # single EUP vrcp push
    p = jnp.where(x >= 0.0, r, z * r)
    alpha_factor = 1.0 - jnp.exp((p - t - 1.0) * inv_alpha)
    loss = bce * alpha_factor

    rows, lanes = loss.shape
    # Row-granular bookkeeping (stays in int32 range far longer than element
    # indices would).
    tile_row_start = (c * k_tiles + k) * rows
    fully_valid = tile_row_start + rows <= valid_rows

    @pl.when(fully_valid)
    def _acc_full():
        # Sublane-tile-aligned reshape; leading-axis sum is pure VPU vreg adds.
        acc_ref[...] += loss.reshape(rows // SUBLANE, SUBLANE, lanes).sum(axis=0)

    @pl.when(jnp.logical_not(fully_valid))
    def _acc_masked():
        ridx = lax.broadcasted_iota(jnp.int32, (rows, lanes), 0)
        keep = (tile_row_start + ridx) < valid_rows
        masked = jnp.where(keep, loss, 0.0)      # select -> OOB garbage discarded
        acc_ref[...] += masked.reshape(rows // SUBLANE, SUBLANE, lanes).sum(axis=0)

    @pl.when(k == n_k - 1)
    def _finalize():
        out_ref[...] = acc_ref[...]              # (8,128) partial; reduced in wrapper


def _elementwise_f32(x, t, inv_alpha):
    # Plain-jnp copy of the kernel math, used only for the <128-element tail.
    x = x.astype(jnp.float32)
    t = t.astype(jnp.float32)
    z = jnp.exp(-jnp.abs(x))
    bce = jnp.maximum(x, 0.0) - x * t + jnp.log1p(z)
    p = jnp.where(x >= 0.0, 1.0 / (1.0 + z), z / (1.0 + z))
    alpha_factor = 1.0 - jnp.exp((p - t - 1.0) * inv_alpha)
    return bce * alpha_factor


def _choose_tile_rows(rows):
    # Biggest power-of-two row tile <= MAX_TILE_ROWS that doesn't massively
    # over-read tiny inputs; always a multiple of 8 (sublane alignment).
    tile = MAX_TILE_ROWS
    while tile > SUBLANE and tile > rows:
        tile //= 2
    return tile


def _tensorcores_per_chip():
    # v7x exposes 2 TensorCores per chip; v5e/v6e (the other targets) have 1.
    # Any failure to identify the chip falls back to 1 split (always correct).
    try:
        kind = jax.devices()[0].device_kind.lower()
    except Exception:
        return 1
    return 2 if "7" in kind else 1


def bce_blur_with_logits_loss(pred, true, alpha=0.05):
    assert pred.shape == true.shape
    n = int(pred.size)
    inv_alpha = 1.0 / (float(alpha) + 1e-4)

    pred_flat = pred.reshape(-1)
    true_flat = true.reshape(-1)

    # Lane-aligned prefix goes through the kernel via a pure reshape (no
    # whole-array pad copy); the <=127-element ragged tail is summed in jnp.
    n_main = (n // LANE) * LANE
    if n_main < n:
        tail_sum = jnp.sum(
            _elementwise_f32(pred_flat[n_main:], true_flat[n_main:], inv_alpha))
    else:
        tail_sum = jnp.float32(0.0)

    if n_main == 0:                      # whole input handled by the tail path
        return tail_sum / jnp.float32(n)

    rows = n_main // LANE
    pred2d = (pred_flat if n_main == n else pred_flat[:n_main]).reshape(rows, LANE)
    true2d = (true_flat if n_main == n else true_flat[:n_main]).reshape(rows, LANE)

    tile_rows = _choose_tile_rows(rows)
    tiles_needed = pl.cdiv(rows, tile_rows)
    splits = min(_tensorcores_per_chip(), tiles_needed)
    k_tiles = pl.cdiv(tiles_needed, splits)

    if splits * k_tiles == tiles_needed:
        index_map = lambda c, k: (c * k_tiles + k, 0)
    else:
        # Odd tile count on a 2-core split: clamp so no block start lies fully
        # outside the array; the kernel's row mask zeroes the duplicated reads.
        index_map = lambda c, k: (jnp.minimum(c * k_tiles + k, tiles_needed - 1), 0)
    in_spec = pl.BlockSpec((tile_rows, LANE), index_map)

    kernel = functools.partial(_bce_blur_kernel, inv_alpha=inv_alpha,
                               valid_rows=rows, k_tiles=k_tiles)

    in_bytes = (jnp.dtype(pred.dtype).itemsize + jnp.dtype(true.dtype).itemsize)
    cost = pl.CostEstimate(
        flops=12 * n_main,
        transcendentals=4 * n_main,
        bytes_accessed=n_main * in_bytes + splits * SUBLANE * LANE * 4)

    def _call(dim_sems):
        return pl.pallas_call(
            kernel,
            out_shape=jax.ShapeDtypeStruct((splits, SUBLANE, LANE), jnp.float32),
            grid_spec=pltpu.PrefetchScalarGridSpec(
                num_scalar_prefetch=0,
                grid=(splits, k_tiles),
                in_specs=[in_spec, in_spec],
                out_specs=pl.BlockSpec((None, SUBLANE, LANE),
                                       lambda c, k: (c, 0, 0)),
                scratch_shapes=[pltpu.VMEM((SUBLANE, LANE), jnp.float32)],
            ),
            compiler_params=pltpu.CompilerParams(dimension_semantics=dim_sems),
            cost_estimate=cost,
        )(pred2d, true2d)

    if splits == 1:
        partials = _call(("arbitrary", "arbitrary"))
    else:
        # v7x: make the 2-TensorCore split explicit; fall back to the plain
        # "parallel" tag if CORE_PARALLEL is rejected by this compiler build.
        try:
            partials = _call((pltpu.CORE_PARALLEL, pltpu.ARBITRARY))
        except Exception:
            partials = _call(("parallel", "arbitrary"))

    return (jnp.sum(partials) + tail_sum) / jnp.float32(n)


def _reference(pred, true, alpha=0.05):
    x = pred.astype(jnp.float32)
    t = true.astype(jnp.float32)
    loss = jnp.maximum(x, 0.0) - x * t + jnp.log1p(jnp.exp(-jnp.abs(x)))
    p = jax.nn.sigmoid(x)
    dx = p - t
    af = 1.0 - jnp.exp((dx - 1.0) / (alpha + 1e-4))
    return jnp.mean(loss * af)


if __name__ == "__main__":
    key = jax.random.PRNGKey(0)
    k1, k2 = jax.random.split(key)
    # NCHW-shaped logits / targets, as the YOLOv5 loss would see them.
    pred = jax.random.normal(k1, (2, 4, 16, 16), dtype=jnp.float32)
    true = (jax.random.uniform(k2, (2, 4, 16, 16)) > 0.5).astype(jnp.float32)

    out = bce_blur_with_logits_loss(pred, true, alpha=0.05)
    out = jax.block_until_ready(out)

    ref = _reference(pred, true, alpha=0.05)
    # Slightly looser rtol than before: the review-sanctioned approx EUP
    # reciprocal (pl.reciprocal(..., approx=True)) perturbs the sigmoid a hair.
    assert jnp.allclose(out, ref, rtol=1e-3, atol=1e-5), (out, ref)
    print("KERNEL_OK")
</pallas_src>

<mosaic_0001>
module attributes {stable_mosaic.version = 11 : i64} {
  func.func @_bce_blur_kernel(%arg0: i32, %arg1: i32, %arg2: memref<16x128xf32, #tpu.memory_space<vmem>>, %arg3: memref<16x128xf32, #tpu.memory_space<vmem>>, %arg4: memref<1x8x128xf32, #tpu.memory_space<vmem>>, %arg5: memref<8x128xf32, #tpu.memory_space<vmem>>) attributes {dimension_semantics = [#tpu.dimension_semantics<arbitrary>, #tpu.dimension_semantics<arbitrary>], iteration_bounds = array<i64: 1, 1>, scalar_prefetch = 0 : i64, scratch_operands = 1 : i64, tpu.core_type = #tpu.core_type<tc>, window_params = [{transform_indices = @transform_0, window_bounds = array<i64: 16, 128>}, {transform_indices = @transform_1, window_bounds = array<i64: 16, 128>}, {transform_indices = @transform_2, window_bounds = array<i64: 1, 8, 128>}]} {
    %c0_i32 = arith.constant 0 : i32
    %0 = arith.cmpi eq, %arg1, %c0_i32 : i32
    %1 = arith.extui %0 : i1 to i32
    %c0_i32_0 = arith.constant 0 : i32
    %2 = arith.cmpi ne, %1, %c0_i32_0 : i32
    scf.if %2 {
      %cst_16 = arith.constant 0.000000e+00 : f32
      %44 = vector.broadcast %cst_16 : f32 to vector<8x128xf32>
      %c0_17 = arith.constant 0 : index
      %c0_18 = arith.constant 0 : index
      %45 = vector.load %arg5[%c0_17, %c0_18] : memref<8x128xf32, #tpu.memory_space<vmem>>, vector<8x128xf32>
      tpu.vector_store %arg5[%c0_17, %c0_18], %44 {strides = array<i32>} : memref<8x128xf32, #tpu.memory_space<vmem>>, vector<8x128xf32>,
    } else {
    }
    %c0 = arith.constant 0 : index
    %c0_1 = arith.constant 0 : index
    %3 = vector.load %arg2[%c0, %c0_1] : memref<16x128xf32, #tpu.memory_space<vmem>>, vector<16x128xf32>
    %c0_2 = arith.constant 0 : index
    %c0_3 = arith.constant 0 : index
    %4 = vector.load %arg3[%c0_2, %c0_3] : memref<16x128xf32, #tpu.memory_space<vmem>>, vector<16x128xf32>
    %5 = math.absf %3 : vector<16x128xf32>
    %cst = arith.constant 0.000000e+00 : f32
    %6 = vector.broadcast %cst : f32 to vector<16x128xf32>
    %7 = arith.subf %6, %5 : vector<16x128xf32>
    %8 = math.exp %7 : vector<16x128xf32>
    %cst_4 = arith.constant 0.000000e+00 : f32
    %9 = vector.broadcast %cst_4 : f32 to vector<16x128xf32>
    %10 = arith.maximumf %3, %9 : vector<16x128xf32>
    %11 = arith.mulf %3, %4 : vector<16x128xf32>
    %12 = arith.subf %10, %11 : vector<16x128xf32>
    %13 = math.log1p %8 : vector<16x128xf32>
    %14 = arith.addf %12, %13 : vector<16x128xf32>
    %cst_5 = arith.constant 1.000000e+00 : f32
    %15 = vector.broadcast %cst_5 : f32 to vector<16x128xf32>
    %16 = arith.addf %15, %8 : vector<16x128xf32>
    %17 = tpu.reciprocal %16 {approx = true} : vector<16x128xf32> -> vector<16x128xf32>
    %cst_6 = arith.constant 0.000000e+00 : f32
    %18 = vector.broadcast %cst_6 : f32 to vector<16x128xf32>
    %19 = arith.cmpf oge, %3, %18 : vector<16x128xf32>
    %20 = arith.mulf %8, %17 : vector<16x128xf32>
    %21 = arith.select %19, %17, %20 : vector<16x128xi1>, vector<16x128xf32>
    %22 = arith.subf %21, %4 : vector<16x128xf32>
    %cst_7 = arith.constant 1.000000e+00 : f32
    %23 = vector.broadcast %cst_7 : f32 to vector<16x128xf32>
    %24 = arith.subf %22, %23 : vector<16x128xf32>
    %cst_8 = arith.constant 19.9600792 : f32
    %25 = vector.broadcast %cst_8 : f32 to vector<16x128xf32>
    %26 = arith.mulf %24, %25 : vector<16x128xf32>
    %27 = math.exp %26 : vector<16x128xf32>
    %cst_9 = arith.constant 1.000000e+00 : f32
    %28 = vector.broadcast %cst_9 : f32 to vector<16x128xf32>
    %29 = arith.subf %28, %27 : vector<16x128xf32>
    %30 = arith.mulf %14, %29 : vector<16x128xf32>
    %c1_i32 = arith.constant 1 : i32
    %31 = arith.muli %arg0, %c1_i32 : i32
    %32 = arith.addi %31, %arg1 : i32
    %c16_i32 = arith.constant 16 : i32
    %33 = arith.muli %32, %c16_i32 : i32
    %c16_i32_10 = arith.constant 16 : i32
    %34 = arith.addi %33, %c16_i32_10 : i32
    %c16_i32_11 = arith.constant 16 : i32
    %35 = arith.cmpi sle, %34, %c16_i32_11 : i32
    %36 = arith.extui %35 : i1 to i32
    %c0_i32_12 = arith.constant 0 : i32
    %37 = arith.cmpi ne, %36, %c0_i32_12 : i32
    scf.if %37 {
      %c0_16 = arith.constant 0 : index
      %c0_17 = arith.constant 0 : index
      %44 = vector.load %arg5[%c0_16, %c0_17] : memref<8x128xf32, #tpu.memory_space<vmem>>, vector<8x128xf32>
      %45 = vector.shape_cast %30 : vector<16x128xf32> to vector<2x8x128xf32>
      %cst_18 = arith.constant dense<0.000000e+00> : vector<8x128xf32>
      %46 = vector.multi_reduction <add>, %45, %cst_18 [0] : vector<2x8x128xf32> to vector<8x128xf32>
      %47 = arith.addf %44, %46 : vector<8x128xf32>
      %c0_19 = arith.constant 0 : index
      %c0_20 = arith.constant 0 : index
      %48 = vector.load %arg5[%c0_19, %c0_20] : memref<8x128xf32, #tpu.memory_space<vmem>>, vector<8x128xf32>
      tpu.vector_store %arg5[%c0_19, %c0_20], %47 {strides = array<i32>} : memref<8x128xf32, #tpu.memory_space<vmem>>, vector<8x128xf32>,
    } else {
    }
    %true = arith.constant true
    %38 = arith.xori %35, %true : i1
    %39 = arith.extui %38 : i1 to i32
    %c0_i32_13 = arith.constant 0 : i32
    %40 = arith.cmpi ne, %39, %c0_i32_13 : i32
    scf.if %40 {
      %44 = tpu.iota {dimensions = array<i32: 0>} : vector<16x128xi32>
      %45 = vector.broadcast %33 : i32 to vector<16x128xi32>
      %46 = arith.addi %45, %44 : vector<16x128xi32>
      %c16_i32_16 = arith.constant 16 : i32
      %47 = vector.broadcast %c16_i32_16 : i32 to vector<16x128xi32>
      %48 = arith.cmpi slt, %46, %47 : vector<16x128xi32>
      %cst_17 = arith.constant 0.000000e+00 : f32
      %49 = vector.broadcast %cst_17 : f32 to vector<16x128xf32>
      %50 = arith.select %48, %30, %49 : vector<16x128xi1>, vector<16x128xf32>
      %c0_18 = arith.constant 0 : index
      %c0_19 = arith.constant 0 : index
      %51 = vector.load %arg5[%c0_18, %c0_19] : memref<8x128xf32, #tpu.memory_space<vmem>>, vector<8x128xf32>
      %52 = vector.shape_cast %50 : vector<16x128xf32> to vector<2x8x128xf32>
      %cst_20 = arith.constant dense<0.000000e+00> : vector<8x128xf32>
      %53 = vector.multi_reduction <add>, %52, %cst_20 [0] : vector<2x8x128xf32> to vector<8x128xf32>
      %54 = arith.addf %51, %53 : vector<8x128xf32>
      %c0_21 = arith.constant 0 : index
      %c0_22 = arith.constant 0 : index
      %55 = vector.load %arg5[%c0_21, %c0_22] : memref<8x128xf32, #tpu.memory_space<vmem>>, vector<8x128xf32>
      tpu.vector_store %arg5[%c0_21, %c0_22], %54 {strides = array<i32>} : memref<8x128xf32, #tpu.memory_space<vmem>>, vector<8x128xf32>,
    } else {
    }
    %c0_i32_14 = arith.constant 0 : i32
    %41 = arith.cmpi eq, %arg1, %c0_i32_14 : i32
    %42 = arith.extui %41 : i1 to i32
    %c0_i32_15 = arith.constant 0 : i32
    %43 = arith.cmpi ne, %42, %c0_i32_15 : i32
    scf.if %43 {
      %c0_16 = arith.constant 0 : index
      %c0_17 = arith.constant 0 : index
      %44 = vector.load %arg5[%c0_16, %c0_17] : memref<8x128xf32, #tpu.memory_space<vmem>>, vector<8x128xf32>
      %c0_18 = arith.constant 0 : index
      %c0_19 = arith.constant 0 : index
      %c0_20 = arith.constant 0 : index
      %45 = vector.load %arg4[%c0_18, %c0_19, %c0_20] : memref<1x8x128xf32, #tpu.memory_space<vmem>>, vector<1x8x128xf32>
      %46 = vector.shape_cast %45 : vector<1x8x128xf32> to vector<8x128xf32>
      %47 = vector.shape_cast %44 : vector<8x128xf32> to vector<1x8x128xf32>
      tpu.vector_store %arg4[%c0_18, %c0_19, %c0_20], %47 {strides = array<i32>} : memref<1x8x128xf32, #tpu.memory_space<vmem>>, vector<1x8x128xf32>,
    } else {
    }
    return
  }
  func.func @transform_0(%arg0: i32, %arg1: i32) -> (i32, i32) {
    %c1_i32 = arith.constant 1 : i32
    %0 = arith.muli %arg0, %c1_i32 : i32
    %1 = arith.addi %0, %arg1 : i32
    %c0_i32 = arith.constant 0 : i32
    %c0_i32_0 = arith.constant 0 : i32
    return %1, %c0_i32 : i32, i32
  }
  func.func @transform_1(%arg0: i32, %arg1: i32) -> (i32, i32) {
    %c1_i32 = arith.constant 1 : i32
    %0 = arith.muli %arg0, %c1_i32 : i32
    %1 = arith.addi %0, %arg1 : i32
    %c0_i32 = arith.constant 0 : i32
    %c0_i32_0 = arith.constant 0 : i32
    return %1, %c0_i32 : i32, i32
  }
  func.func @transform_2(%arg0: i32, %arg1: i32) -> (i32, i32, i32) {
    %c0_i32 = arith.constant 0 : i32
    %c0_i32_0 = arith.constant 0 : i32
    %c0_i32_1 = arith.constant 0 : i32
    return %arg0, %c0_i32, %c0_i32_0 : i32, i32, i32
  }
}

</mosaic_0001>

<bundles_post_ra>
// kernel: tpu_custom_call.1
= control target key start
LH: loop header
LB: loop body
LE: loop exit
PB: predicated region body
PF: predicated region fallthrough
CT: control target
= control target key end

     0   :  { %7 = vsyncpa [#allocation4], 0  ;;  %s287_s0 = inlined_call_operand.hbm [shape: f32[16,128], index: 0, kind: input, shape index: {}]   ;;  %s288_s1 = inlined_call_operand.hbm [shape: f32[16,128], index: 1, kind: input, shape index: {}]   ;;  %s289_s2 = inlined_call_operand.hbm [shape: f32[1,8,128], index: 2, kind: output, shape index: {}]  }
   0x1   :  { %8 = vsyncpa [#allocation7], 0 }
   0x2   :  { %9 = vsyncpa [#allocation5], 0  ;;  %s258_s9 = smov [#allocation3]  }
   0x3   :  { %s19_s10 = sshll.u32 %s258_s9, 4  ;;  %s20_s10 = int_to_ptr.vmem [resolvable:$true] %s19_s10 }
   0x4   :  { %s200_s11 = scalar_lea.vmem %s20_s10, 256  ;;  %p205_p1 = scmp.lt.s32.totalorder %s20_s10, %s20_s10 }
   0x5   :  { %p201_p0 = scmp.ne.s32.totalorder %s20_s10, %s200_s11  ;;  %p206_p2 = scmp.lt.s32.totalorder %s200_s11, %s200_s11 }
   0x7   :  { %p207_p3 = por %p206_p2, %p205_p1 }
   0x9   :  { %p208_p4 = pnand %p207_p3, %p201_p0 }
   0xb   :  { %211 = shalt.err (!%p208_p4)
}
   0xc   :  { %s259_s12 = smov 128   ;;  %s260_s13 = smov 8  }
   0xd   :  { %25 = dma.hbm_to_vmem [thread:$0]  %s287_s0, 256, %s20_s10, [#allocation4], %s259_s12, %s259_s12, %s260_s13  }
   0xe   :  { %s261_s16 = smov [#allocation6]  }
   0xf   :  { %s35_s17 = sshll.u32 %s261_s16, 4  ;;  %s36_s17 = int_to_ptr.vmem [resolvable:$true] %s35_s17 }
  0x10   :  { %s220_s18 = scalar_lea.vmem %s36_s17, 256  ;;  %p225_p6 = scmp.lt.s32.totalorder %s36_s17, %s36_s17 }
  0x11   :  { %p221_p5 = scmp.ne.s32.totalorder %s36_s17, %s220_s18  ;;  %p226_p7 = scmp.lt.s32.totalorder %s220_s18, %s220_s18 }
  0x13   :  { %p227_p8 = por %p226_p7, %p225_p6 }
  0x15   :  { %p228_p9 = pnand %p227_p8, %p221_p5 }
  0x17   :  { %231 = shalt.err (!%p228_p9)
}
  0x18   :  { %41 = dma.hbm_to_vmem [thread:$0]  %s288_s1, 256, %s36_s17, [#allocation7], %s259_s12, %s259_s12, %s260_s13  }
  0x19   :  { %252 = dma.done.wait [#allocation4], 256  }
  0x1a   :  { %253 = vsyncadd [#allocation4], 4294967040 }
  0x1b   :  { %254 = dma.done.wait [#allocation7], 256  }
  0x1c   :  { %255 = vsyncadd [#allocation7], 4294967040  ;;  %v57_v0 = vld [vmem:[#allocation3] sm:$0xff]  ;;  %v58_v1 = vld [vmem:[#allocation3 + $0x8] sm:$0xff]  ;;  %s262_s0 = smov [#allocation8]  }
  0x1d   :  { %v61_v2 = vand.u32 2147483647, %v57_v0  ;;  %v62_v3 = vand.u32 2147483647, %v58_v1  ;;  %vm99_vm0 = vcmp.ge.f32.partialorder %v57_v0, 0.0  ;;  %v59_v14 = vld [vmem:[#allocation6] sm:$0xff] }
  0x1e   :  { %vm100_vm1 = vcmp.ge.f32.partialorder %v58_v1, 0.0  ;;  %v60_v16 = vld [vmem:[#allocation6 + $0x8] sm:$0xff]  ;;  %v69_v36 = vmax.f32 %v57_v0, 0.0  ;;  %v71_v37 = vmul.f32 %v59_v14, %v57_v0  ;;  %v70_v38 = vmax.f32 %v58_v1, 0.0  ;;  %s159_s1 = sshll.u32 %s262_s0, 4  ;;  %s160_s1 = int_to_ptr.vmem [resolvable:$true] %s159_s1 }
  0x1f   :  { %v63_v4 = vsub.f32 0.0, %v61_v2  ;;  %v64_v5 = vsub.f32 0.0, %v62_v3  ;;  %v72_v39 = vmul.f32 %v60_v16, %v58_v1  ;;  %s232_s21 = scalar_lea.vmem %s160_s1, 128  ;;  %p237_p11 = scmp.lt.s32.totalorder %s160_s1, %s160_s1 }
  0x20   :  { %v73_v44 = vsub.f32 %v69_v36, %v71_v37  ;;  %p233_p10 = scmp.ne.s32.totalorder %s160_s1, %s232_s21  ;;  %p238_p12 = scmp.lt.s32.totalorder %s232_s21, %s232_s21 }
  0x21   :  { %v65_v6 = vmul.f32 1.442695, %v63_v4  ;;  %v67_v7 = vmul.f32 1.442695, %v64_v5  ;;  %v74_v45 = vsub.f32 %v70_v38, %v72_v39 }
  0x22   :  { %p239_p13 = por %p238_p12, %p237_p11 }
  0x23   :  { %176 = vpow2.f32 %v65_v6 }
  0x24   :  { %178 = vpow2.f32 %v67_v7  ;;  %p240_p0 = pnand %p239_p13, %p233_p10 }
  0x30   :  { %v177_v8 = vpop.eup %176 }
  0x31   :  { %v179_v9 = vpop.eup %178  ;;  %v75_v10 = vadd.f32 1.0, %v177_v8  ;;  %v78_v25 = vmul.f32 -0.5, %v177_v8  ;;  %v81_v32 = vand.u32 2147483647, %v177_v8 }
  0x32   :  { %v84_v11 = vadd.f32 1.0, %v179_v9  ;;  %v87_v27 = vmul.f32 -0.5, %v179_v9  ;;  %v90_v35 = vand.u32 2147483647, %v179_v9 }
  0x33   :  { %180 = vrcp.f32 %v75_v10  ;;  %v79_v30 = vadd.f32 1.0, %v78_v25  ;;  %vm82_vm2 = vcmp.lt.f32.partialorder %v81_v32, 0.0004427343 }
  0x34   :  { %182 = vrcp.f32 %v84_v11  ;;  %v88_v33 = vadd.f32 1.0, %v87_v27  ;;  %vm91_vm3 = vcmp.lt.f32.partialorder %v90_v35, 0.0004427343 }
  0x35   :  { %184 = vlog2.f32 %v75_v10  ;;  %v80_v41 = vmul.f32 %v177_v8, %v79_v30 }
  0x36   :  { %186 = vlog2.f32 %v84_v11  ;;  %v89_v43 = vmul.f32 %v179_v9, %v88_v33 }
  0x40   :  { %v181_v12 = vpop.eup %180 }
  0x41   :  { %v183_v13 = vpop.eup %182  ;;  %v101_v15 = vmul.f32 %v181_v12, %v177_v8 }
  0x42   :  { %v102_v17 = vmul.f32 %v183_v13, %v179_v9  ;;  %v185_v31 = vpop.eup %184 }
  0x43   :  { %v103_v18 = vsel %vm99_vm0, %v181_v12, %v101_v15  ;;  %v187_v34 = vpop.eup %186  ;;  %v77_v40 = vmul.f32 0.6931472, %v185_v31 }
  0x44   :  { %v104_v19 = vsel %vm100_vm1, %v183_v13, %v102_v17  ;;  %v105_v20 = vsub.f32 %v103_v18, %v59_v14  ;;  %v86_v42 = vmul.f32 0.6931472, %v187_v34 }
  0x45   :  { %v106_v21 = vsub.f32 %v104_v19, %v60_v16  ;;  %v83_v46 = vsel %vm82_vm2, %v80_v41, %v77_v40 }
  0x46   :  { %v169_v22 = vadd.f32 -1.0, %v105_v20  ;;  %v92_v47 = vsel %vm91_vm3, %v89_v43, %v86_v42  ;;  %v93_v48 = vadd.f32 %v83_v46, %v73_v44 }
  0x47   :  { %v170_v23 = vadd.f32 -1.0, %v106_v21  ;;  %v94_v50 = vadd.f32 %v92_v47, %v74_v45 }
  0x48   :  { %v109_v24 = vmul.f32 19.96008, %v169_v22 }
  0x49   :  { %v110_v26 = vmul.f32 19.96008, %v170_v23 }
  0x4a   :  { %v111_v28 = vmul.f32 1.442695, %v109_v24 }
  0x4b   :  { %v113_v29 = vmul.f32 1.442695, %v110_v26 }
  0x4c   :  { %188 = vpow2.f32 %v111_v28 }
  0x4d   :  { %190 = vpow2.f32 %v113_v29 }
  0x59   :  { %v189_v49 = vpop.eup %188 }
  0x5a   :  { %v191_v51 = vpop.eup %190  ;;  %v115_v52 = vsub.f32 1.0, %v189_v49 }
  0x5b   :  { %v116_v53 = vsub.f32 1.0, %v191_v51 }
  0x5c   :  { %v117_v54 = vmul.f32 %v115_v52, %v93_v48 }
  0x5d   :  { %v118_v55 = vmul.f32 %v116_v53, %v94_v50 }
  0x5f   :  { %v127_v56 = vadd.f32 %v118_v55, %v117_v54 }
  0x61   :  { %152 = vst [vmem:[#allocation8] sm:$0xff] %v127_v56 }
  0x62   :  { %243 = shalt.err (!%p240_p0)
}
  0x63   :  { %162 = dma.vmem_to_hbm [thread:$0]  %s160_s1, 128, %s289_s2, [#allocation5]  }
  0x64   :  { %256 = dma.done.wait [#allocation5], 128  }
  0x65   :  { %257 = vsyncadd [#allocation5], 4294967168 }
  0x66   :  { %166 = vsyncpa [#allocation4], 1 }
  0x67   :  { %167 = vsyncpa [#allocation7], 1 }
  0x68   :  { %168 = vsyncpa [#allocation5], 1 }

</bundles_post_ra>
